<compile_context>
chip_gen: v7x
topology: tpu7x:2x2x1
jax: 0.10.0
libtpu: 0.0.40
codegen_flags: <defaults>
</compile_context>

<pallas_src>
import functools
import math

import jax
import jax.numpy as jnp
from jax.experimental import pallas as pl
from jax.experimental.pallas import tpu as pltpu


def _layernorm_kernel(x_ref, w_ref, b_ref, o_ref, *, epsilon, d_model, groups):
    """Normalize `groups` independent length-d_model segments per row.

    One-pass reductions (sum, sum of squares) keep only the f32 upcast of the
    tile and the f32 result long-lived; var is clamped at 0 to guard the
    E[x^2]-E[x]^2 cancellation (precision note from review).
    """
    x = x_ref[...].astype(jnp.float32)          # (bm, groups*d_model)
    w = w_ref[...].astype(jnp.float32)          # (1, groups*d_model)
    b = b_ref[...].astype(jnp.float32)
    inv_n = 1.0 / d_model
    inv_nm1 = 1.0 / (d_model - 1)

    parts = []
    for k in range(groups):                     # static unroll; groups <= 16
        xs = x if groups == 1 else x[:, k * d_model:(k + 1) * d_model]
        s = jnp.sum(xs, axis=-1, keepdims=True)
        sq = jnp.sum(xs * xs, axis=-1, keepdims=True)
        mean = s * inv_n
        # torch.Tensor.std default: unbiased estimator (divisor d_model - 1).
        var = jnp.maximum((sq - mean * mean * d_model) * inv_nm1, 0.0)
        std = jnp.sqrt(var)
        # eps added to std (NOT inside the sqrt) — matches the reference module
        # (this is intentionally NOT torch.nn.LayerNorm semantics).
        inv = pl.reciprocal(std + epsilon, approx=False)
        parts.append((xs - mean) * inv)
    xn = parts[0] if groups == 1 else jnp.concatenate(parts, axis=-1)
    o_ref[...] = (xn * w + b).astype(o_ref.dtype)


def _chip_params():
    """(tile_budget_bytes, vmem_limit_bytes, min_grid_steps) per generation."""
    kind = ""
    try:
        kind = jax.devices()[0].device_kind.lower()
    except Exception:
        pass
    if "v7" in kind:
        # 64 MiB VMEM per TensorCore -> hard 48 MiB cap; keep >=4 grid steps so
        # the "parallel" axis can shard across both TensorCores.
        return 40 << 20, 48 << 20, 4
    # v5e / v6e (128 MiB physical VMEM) and unknown chips: larger tiles.
    return 56 << 20, 64 << 20, 2


def layernorm_pallas(x, w_ln, b_ln, epsilon=0.0001, use_ln=True,
                     block_rows=None, allow_repack=True):
    """x: [..., d_model]; w_ln, b_ln: [d_model].

    Pure HBM-bandwidth-bound op: row tiles are auto-sized from the f32 working
    set per generation, there is no wrapper-side padding copy, and the grid is
    1-D "parallel" so multi-TC chips (v7x) can shard it.
    """
    if not use_ln:
        return x

    d_model = x.shape[-1]
    assert d_model > 1, "unbiased std (divisor d_model-1) undefined for d_model == 1"
    orig_shape = x.shape
    x2d = x.reshape(-1, d_model)
    rows = x2d.shape[0]

    # Lane-dense repack for narrow d_model: pack g rows into one kernel row of
    # width g*d_model (a multiple of 128) so vector stores / DMAs are dense.
    groups = 1
    if allow_repack and d_model % 128 != 0:
        g = 128 // math.gcd(d_model, 128)
        if 1 < g <= 16 and rows % g == 0:
            groups = g
    # TODO(synk): when rows % g != 0 a padding copy would be required; we fall
    # back to the masked-partial-store path instead.
    width = groups * d_model
    rows_k = rows // groups
    xk = x2d.reshape(rows_k, width)            # free, contiguous view
    if groups == 1:
        wk = w_ln.reshape(1, d_model)
        bk = b_ln.reshape(1, d_model)
    else:
        wk = jnp.tile(w_ln.reshape(-1), groups).reshape(1, width)
        bk = jnp.tile(b_ln.reshape(-1), groups).reshape(1, width)

    tile_budget, vmem_limit, min_steps = _chip_params()
    itemsize = jnp.dtype(x2d.dtype).itemsize
    # Per-row VMEM footprint: 2x double-buffered input + 2x output tiles (input
    # dtype) plus ~4 f32-tile-equivalents of in-kernel scratch (f32 upcast,
    # f32 result, per-segment temporaries) — budgeted in f32, not itemsize.
    bytes_per_row = width * (4 * itemsize + 4 * 4)

    if block_rows is None:
        block_rows = (tile_budget // bytes_per_row) // 8 * 8
    rows_ceil8 = ((rows_k + 7) // 8) * 8
    # Guarantee >= min_steps grid steps when possible (megacore sharding on v7x).
    steps_cap = max(8, (rows_ceil8 // min_steps) // 8 * 8)
    block_rows = int(min(block_rows, rows_ceil8, steps_cap))
    block_rows = max(8, (block_rows // 8) * 8)

    grid = (pl.cdiv(rows_k, block_rows),)      # partial last block is masked

    kernel = functools.partial(_layernorm_kernel, epsilon=epsilon,
                               d_model=d_model, groups=groups)

    # TODO(synk): a standalone LN is capped at (bytes_in + bytes_out)/HBM-BW;
    # fusing with the preceding residual add or following projection is the
    # only step-change beyond this roofline.
    out = pl.pallas_call(
        kernel,
        out_shape=jax.ShapeDtypeStruct((rows_k, width), x.dtype),
        grid_spec=pltpu.PrefetchScalarGridSpec(
            num_scalar_prefetch=0,
            grid=grid,
            in_specs=[
                pl.BlockSpec((block_rows, width), lambda i: (i, 0)),
                pl.BlockSpec((1, width), lambda i: (0, 0)),
                pl.BlockSpec((1, width), lambda i: (0, 0)),
            ],
            out_specs=pl.BlockSpec((block_rows, width), lambda i: (i, 0)),
        ),
        compiler_params=pltpu.CompilerParams(
            dimension_semantics=("parallel",),
            vmem_limit_bytes=int(vmem_limit),
        ),
    )(xk, wk, bk)

    return out.reshape(orig_shape)


if __name__ == "__main__":
    batch, seq, d_model = 2, 8, 32
    key = jax.random.PRNGKey(0)
    x = jax.random.normal(key, (batch, seq, d_model), dtype=jnp.float32)

    # Deterministic parameter init matching nn.Parameter(torch.ones/zeros(d_model)).
    w_ln = jnp.ones((d_model,), dtype=jnp.float32)
    b_ln = jnp.zeros((d_model,), dtype=jnp.float32)
    epsilon = 0.0001

    out = layernorm_pallas(x, w_ln, b_ln, epsilon=epsilon, use_ln=True)
    out = jax.block_until_ready(out)

    # Pure-JAX reference (unbiased std, eps added to std) for sanity checking.
    mean = x.mean(axis=-1, keepdims=True)
    xc = x - mean
    std = jnp.sqrt(jnp.sum(xc * xc, axis=-1, keepdims=True) / (d_model - 1))
    ref = (xc / (std + epsilon)) * w_ln + b_ln
    assert jnp.allclose(out, ref, atol=1e-5, rtol=1e-5), "mismatch vs reference"

    print("KERNEL_OK")
</pallas_src>

<mosaic_0001>
module attributes {stable_mosaic.version = 11 : i64} {
  func.func @_layernorm_kernel(%arg0: i32, %arg1: memref<8x128xf32, #tpu.memory_space<vmem>>, %arg2: memref<1x128xf32, #tpu.memory_space<vmem>>, %arg3: memref<1x128xf32, #tpu.memory_space<vmem>>, %arg4: memref<8x128xf32, #tpu.memory_space<vmem>>) attributes {dimension_semantics = [#tpu.dimension_semantics<parallel>], iteration_bounds = array<i64: 1>, scalar_prefetch = 0 : i64, scratch_operands = 0 : i64, tpu.core_type = #tpu.core_type<tc>, window_params = [{transform_indices = @transform_0, window_bounds = array<i64: 8, 128>}, {pipeline_mode = #tpu.pipeline_mode<synchronous>, transform_indices = @transform_1, window_bounds = array<i64: 1, 128>}, {pipeline_mode = #tpu.pipeline_mode<synchronous>, transform_indices = @transform_2, window_bounds = array<i64: 1, 128>}, {transform_indices = @transform_3, window_bounds = array<i64: 8, 128>}]} {
    %c0 = arith.constant 0 : index
    %c0_0 = arith.constant 0 : index
    %0 = vector.load %arg1[%c0, %c0_0] : memref<8x128xf32, #tpu.memory_space<vmem>>, vector<8x128xf32>
    %c0_1 = arith.constant 0 : index
    %c0_2 = arith.constant 0 : index
    %1 = vector.load %arg2[%c0_1, %c0_2] : memref<1x128xf32, #tpu.memory_space<vmem>>, vector<1x128xf32>
    %c0_3 = arith.constant 0 : index
    %c0_4 = arith.constant 0 : index
    %2 = vector.load %arg3[%c0_3, %c0_4] : memref<1x128xf32, #tpu.memory_space<vmem>>, vector<1x128xf32>
    %3 = vector.extract_strided_slice %0 {offsets = [0, 0], sizes = [8, 32], strides = [1, 1]} : vector<8x128xf32> to vector<8x32xf32>
    %cst = arith.constant dense<0.000000e+00> : vector<8xf32>
    %4 = vector.multi_reduction <add>, %3, %cst [1] : vector<8x32xf32> to vector<8xf32>
    %5 = vector.shape_cast %4 : vector<8xf32> to vector<8x1xf32>
    %6 = arith.mulf %3, %3 : vector<8x32xf32>
    %cst_5 = arith.constant dense<0.000000e+00> : vector<8xf32>
    %7 = vector.multi_reduction <add>, %6, %cst_5 [1] : vector<8x32xf32> to vector<8xf32>
    %8 = vector.shape_cast %7 : vector<8xf32> to vector<8x1xf32>
    %cst_6 = arith.constant 3.125000e-02 : f32
    %9 = vector.broadcast %cst_6 : f32 to vector<8x1xf32>
    %10 = arith.mulf %5, %9 : vector<8x1xf32>
    %11 = arith.mulf %10, %10 : vector<8x1xf32>
    %cst_7 = arith.constant 3.200000e+01 : f32
    %12 = vector.broadcast %cst_7 : f32 to vector<8x1xf32>
    %13 = arith.mulf %11, %12 : vector<8x1xf32>
    %14 = arith.subf %8, %13 : vector<8x1xf32>
    %cst_8 = arith.constant 0.0322580636 : f32
    %15 = vector.broadcast %cst_8 : f32 to vector<8x1xf32>
    %16 = arith.mulf %14, %15 : vector<8x1xf32>
    %cst_9 = arith.constant 0.000000e+00 : f32
    %17 = vector.broadcast %cst_9 : f32 to vector<8x1xf32>
    %18 = arith.maximumf %16, %17 : vector<8x1xf32>
    %19 = math.sqrt %18 : vector<8x1xf32>
    %cst_10 = arith.constant 9.99999974E-5 : f32
    %20 = vector.broadcast %cst_10 : f32 to vector<8x1xf32>
    %21 = arith.addf %19, %20 : vector<8x1xf32>
    %22 = tpu.reciprocal %21 : vector<8x1xf32> -> vector<8x1xf32>
    %23 = vector.broadcast %10 : vector<8x1xf32> to vector<8x32xf32>
    %24 = arith.subf %3, %23 : vector<8x32xf32>
    %25 = vector.broadcast %22 : vector<8x1xf32> to vector<8x32xf32>
    %26 = arith.mulf %24, %25 : vector<8x32xf32>
    %27 = vector.extract_strided_slice %0 {offsets = [0, 32], sizes = [8, 32], strides = [1, 1]} : vector<8x128xf32> to vector<8x32xf32>
    %cst_11 = arith.constant dense<0.000000e+00> : vector<8xf32>
    %28 = vector.multi_reduction <add>, %27, %cst_11 [1] : vector<8x32xf32> to vector<8xf32>
    %29 = vector.shape_cast %28 : vector<8xf32> to vector<8x1xf32>
    %30 = arith.mulf %27, %27 : vector<8x32xf32>
    %cst_12 = arith.constant dense<0.000000e+00> : vector<8xf32>
    %31 = vector.multi_reduction <add>, %30, %cst_12 [1] : vector<8x32xf32> to vector<8xf32>
    %32 = vector.shape_cast %31 : vector<8xf32> to vector<8x1xf32>
    %cst_13 = arith.constant 3.125000e-02 : f32
    %33 = vector.broadcast %cst_13 : f32 to vector<8x1xf32>
    %34 = arith.mulf %29, %33 : vector<8x1xf32>
    %35 = arith.mulf %34, %34 : vector<8x1xf32>
    %cst_14 = arith.constant 3.200000e+01 : f32
    %36 = vector.broadcast %cst_14 : f32 to vector<8x1xf32>
    %37 = arith.mulf %35, %36 : vector<8x1xf32>
    %38 = arith.subf %32, %37 : vector<8x1xf32>
    %cst_15 = arith.constant 0.0322580636 : f32
    %39 = vector.broadcast %cst_15 : f32 to vector<8x1xf32>
    %40 = arith.mulf %38, %39 : vector<8x1xf32>
    %cst_16 = arith.constant 0.000000e+00 : f32
    %41 = vector.broadcast %cst_16 : f32 to vector<8x1xf32>
    %42 = arith.maximumf %40, %41 : vector<8x1xf32>
    %43 = math.sqrt %42 : vector<8x1xf32>
    %cst_17 = arith.constant 9.99999974E-5 : f32
    %44 = vector.broadcast %cst_17 : f32 to vector<8x1xf32>
    %45 = arith.addf %43, %44 : vector<8x1xf32>
    %46 = tpu.reciprocal %45 : vector<8x1xf32> -> vector<8x1xf32>
    %47 = vector.broadcast %34 : vector<8x1xf32> to vector<8x32xf32>
    %48 = arith.subf %27, %47 : vector<8x32xf32>
    %49 = vector.broadcast %46 : vector<8x1xf32> to vector<8x32xf32>
    %50 = arith.mulf %48, %49 : vector<8x32xf32>
    %51 = vector.extract_strided_slice %0 {offsets = [0, 64], sizes = [8, 32], strides = [1, 1]} : vector<8x128xf32> to vector<8x32xf32>
    %cst_18 = arith.constant dense<0.000000e+00> : vector<8xf32>
    %52 = vector.multi_reduction <add>, %51, %cst_18 [1] : vector<8x32xf32> to vector<8xf32>
    %53 = vector.shape_cast %52 : vector<8xf32> to vector<8x1xf32>
    %54 = arith.mulf %51, %51 : vector<8x32xf32>
    %cst_19 = arith.constant dense<0.000000e+00> : vector<8xf32>
    %55 = vector.multi_reduction <add>, %54, %cst_19 [1] : vector<8x32xf32> to vector<8xf32>
    %56 = vector.shape_cast %55 : vector<8xf32> to vector<8x1xf32>
    %cst_20 = arith.constant 3.125000e-02 : f32
    %57 = vector.broadcast %cst_20 : f32 to vector<8x1xf32>
    %58 = arith.mulf %53, %57 : vector<8x1xf32>
    %59 = arith.mulf %58, %58 : vector<8x1xf32>
    %cst_21 = arith.constant 3.200000e+01 : f32
    %60 = vector.broadcast %cst_21 : f32 to vector<8x1xf32>
    %61 = arith.mulf %59, %60 : vector<8x1xf32>
    %62 = arith.subf %56, %61 : vector<8x1xf32>
    %cst_22 = arith.constant 0.0322580636 : f32
    %63 = vector.broadcast %cst_22 : f32 to vector<8x1xf32>
    %64 = arith.mulf %62, %63 : vector<8x1xf32>
    %cst_23 = arith.constant 0.000000e+00 : f32
    %65 = vector.broadcast %cst_23 : f32 to vector<8x1xf32>
    %66 = arith.maximumf %64, %65 : vector<8x1xf32>
    %67 = math.sqrt %66 : vector<8x1xf32>
    %cst_24 = arith.constant 9.99999974E-5 : f32
    %68 = vector.broadcast %cst_24 : f32 to vector<8x1xf32>
    %69 = arith.addf %67, %68 : vector<8x1xf32>
    %70 = tpu.reciprocal %69 : vector<8x1xf32> -> vector<8x1xf32>
    %71 = vector.broadcast %58 : vector<8x1xf32> to vector<8x32xf32>
    %72 = arith.subf %51, %71 : vector<8x32xf32>
    %73 = vector.broadcast %70 : vector<8x1xf32> to vector<8x32xf32>
    %74 = arith.mulf %72, %73 : vector<8x32xf32>
    %75 = vector.extract_strided_slice %0 {offsets = [0, 96], sizes = [8, 32], strides = [1, 1]} : vector<8x128xf32> to vector<8x32xf32>
    %cst_25 = arith.constant dense<0.000000e+00> : vector<8xf32>
    %76 = vector.multi_reduction <add>, %75, %cst_25 [1] : vector<8x32xf32> to vector<8xf32>
    %77 = vector.shape_cast %76 : vector<8xf32> to vector<8x1xf32>
    %78 = arith.mulf %75, %75 : vector<8x32xf32>
    %cst_26 = arith.constant dense<0.000000e+00> : vector<8xf32>
    %79 = vector.multi_reduction <add>, %78, %cst_26 [1] : vector<8x32xf32> to vector<8xf32>
    %80 = vector.shape_cast %79 : vector<8xf32> to vector<8x1xf32>
    %cst_27 = arith.constant 3.125000e-02 : f32
    %81 = vector.broadcast %cst_27 : f32 to vector<8x1xf32>
    %82 = arith.mulf %77, %81 : vector<8x1xf32>
    %83 = arith.mulf %82, %82 : vector<8x1xf32>
    %cst_28 = arith.constant 3.200000e+01 : f32
    %84 = vector.broadcast %cst_28 : f32 to vector<8x1xf32>
    %85 = arith.mulf %83, %84 : vector<8x1xf32>
    %86 = arith.subf %80, %85 : vector<8x1xf32>
    %cst_29 = arith.constant 0.0322580636 : f32
    %87 = vector.broadcast %cst_29 : f32 to vector<8x1xf32>
    %88 = arith.mulf %86, %87 : vector<8x1xf32>
    %cst_30 = arith.constant 0.000000e+00 : f32
    %89 = vector.broadcast %cst_30 : f32 to vector<8x1xf32>
    %90 = arith.maximumf %88, %89 : vector<8x1xf32>
    %91 = math.sqrt %90 : vector<8x1xf32>
    %cst_31 = arith.constant 9.99999974E-5 : f32
    %92 = vector.broadcast %cst_31 : f32 to vector<8x1xf32>
    %93 = arith.addf %91, %92 : vector<8x1xf32>
    %94 = tpu.reciprocal %93 : vector<8x1xf32> -> vector<8x1xf32>
    %95 = vector.broadcast %82 : vector<8x1xf32> to vector<8x32xf32>
    %96 = arith.subf %75, %95 : vector<8x32xf32>
    %97 = vector.broadcast %94 : vector<8x1xf32> to vector<8x32xf32>
    %98 = arith.mulf %96, %97 : vector<8x32xf32>
    %99 = tpu.concatenate %26, %50, %74, %98 in 1 : vector<8x32xf32>, vector<8x32xf32>, vector<8x32xf32>, vector<8x32xf32> -> vector<8x128xf32>
    %100 = vector.broadcast %1 : vector<1x128xf32> to vector<8x128xf32>
    %101 = arith.mulf %99, %100 : vector<8x128xf32>
    %102 = vector.broadcast %2 : vector<1x128xf32> to vector<8x128xf32>
    %103 = arith.addf %101, %102 : vector<8x128xf32>
    %c0_32 = arith.constant 0 : index
    %c0_33 = arith.constant 0 : index
    %104 = vector.load %arg4[%c0_32, %c0_33] : memref<8x128xf32, #tpu.memory_space<vmem>>, vector<8x128xf32>
    tpu.vector_store %arg4[%c0_32, %c0_33], %103 {strides = array<i32>} : memref<8x128xf32, #tpu.memory_space<vmem>>, vector<8x128xf32>,
    return
  }
  func.func @transform_0(%arg0: i32) -> (i32, i32) {
    %c0_i32 = arith.constant 0 : i32
    %c0_i32_0 = arith.constant 0 : i32
    return %arg0, %c0_i32 : i32, i32
  }
  func.func @transform_1(%arg0: i32) -> (i32, i32) {
    %c0_i32 = arith.constant 0 : i32
    %c0_i32_0 = arith.constant 0 : i32
    %c0_i32_1 = arith.constant 0 : i32
    return %c0_i32, %c0_i32_0 : i32, i32
  }
  func.func @transform_2(%arg0: i32) -> (i32, i32) {
    %c0_i32 = arith.constant 0 : i32
    %c0_i32_0 = arith.constant 0 : i32
    %c0_i32_1 = arith.constant 0 : i32
    return %c0_i32, %c0_i32_0 : i32, i32
  }
  func.func @transform_3(%arg0: i32) -> (i32, i32) {
    %c0_i32 = arith.constant 0 : i32
    %c0_i32_0 = arith.constant 0 : i32
    return %arg0, %c0_i32 : i32, i32
  }
}

</mosaic_0001>

<bundles_post_ra>
// kernel: tpu_custom_call.1
= control target key start
LH: loop header
LB: loop body
LE: loop exit
PB: predicated region body
PF: predicated region fallthrough
CT: control target
= control target key end

     0   :  { %8 = vsyncpa [#allocation3], 0  ;;  %s460_s0 = inlined_call_operand.hbm [shape: f32[4,128], index: 0, kind: input, shape index: {}]   ;;  %s461_s1 = inlined_call_operand.hbm [shape: f32[1,128], index: 1, kind: input, shape index: {}]   ;;  %s462_s2 = inlined_call_operand.hbm [shape: f32[1,128], index: 2, kind: input, shape index: {}]   ;;  %s463_s3 = inlined_call_operand.hbm [shape: f32[4,128], index: 3, kind: output, shape index: {}]  }
   0x1   :  { %9 = vsyncpa [#allocation6], 0 }
   0x2   :  { %10 = vsyncpa [#allocation4], 0 }
   0x3   :  { %15 = vsyncadd [#allocation3], 64  ;;  %s327_s12 = smov [#allocation5]   ;;  %s328_s14 = smov [#allocation2]  }
   0x4   :  { %s29_s13 = sshll.u32 %s327_s12, 4  ;;  %s16_s15 = sshll.u32 %s328_s14, 4  ;;  %s30_s13 = int_to_ptr.vmem [resolvable:$true] %s29_s13  ;;  %s355_s15 = int_to_ptr.vmem [resolvable:$true] %s16_s15 }
   0x5   :  { %s233_s18 = scalar_lea.hbm %s461_s1, 16 }
   0x6   :  { %p234_p0 = scmp.ne.s32.totalorder %s461_s1, %s233_s18  ;;  %p237_p1 = scmp.lt.u32.totalorder %s233_s18, %s461_s1 }
   0x8   :  { %p239_p2 = pnand %p237_p1, %p234_p0 }
   0xa   :  { %242 = shalt.err (!%p239_p2)
}
   0xb   :  { %s243_s23 = scalar_lea.vmem %s30_s13, 16  ;;  %s247_s24 = scalar_lea.vmem %s30_s13, 32 }
   0xc   :  { %p244_p3 = scmp.ne.s32.totalorder %s30_s13, %s243_s23  ;;  %p248_p4 = scmp.lt.s32.totalorder %s30_s13, %s30_s13 }
   0xd   :  { %p249_p5 = scmp.lt.s32.totalorder %s247_s24, %s243_s23 }
   0xf   :  { %p250_p6 = por %p249_p5, %p248_p4 }
  0x11   :  { %p251_p7 = pnand %p250_p6, %p244_p3 }
  0x13   :  { %254 = shalt.err (!%p251_p7)
}
  0x14   :  { %32 = dma.hbm_to_vmem [thread:$0]  %s461_s1, 16, %s30_s13, [#allocation6]  }
  0x15   :  { %s255_s29 = scalar_lea.hbm %s460_s0, 64 }
  0x16   :  { %p256_p8 = scmp.ne.s32.totalorder %s460_s0, %s255_s29  ;;  %p259_p9 = scmp.lt.u32.totalorder %s255_s29, %s460_s0 }
  0x18   :  { %p261_p10 = pnand %p259_p9, %p256_p8 }
  0x1a   :  { %264 = shalt.err (!%p261_p10)
}
  0x1b   :  { %s265_s7 = scalar_lea.vmem %s355_s15, 64  ;;  %s269_s1 = scalar_lea.vmem %s355_s15, 128 }
  0x1c   :  { %p266_p11 = scmp.ne.s32.totalorder %s355_s15, %s265_s7  ;;  %p270_p12 = scmp.lt.s32.totalorder %s355_s15, %s355_s15 }
  0x1d   :  { %p271_p13 = scmp.lt.s32.totalorder %s269_s1, %s265_s7 }
  0x1f   :  { %p272_p0 = por %p271_p13, %p270_p12 }
  0x21   :  { %p273_p1 = pnand %p272_p0, %p266_p11 }
  0x23   :  { %276 = shalt.err (!%p273_p1)
}
  0x24   :  { %s329_s8 = smov 64   ;;  %s330_s9 = smov 4  }
  0x25   :  { %22 = dma.hbm_to_vmem [thread:$0]  %s460_s0, 64, %s355_s15, [#allocation3], %s329_s8, %s329_s8, %s330_s9  }
  0x26   :  { %s331_s12 = smov [#allocation7]   ;;  %s277_s17 = scalar_lea.hbm %s462_s2, 16 }
  0x27   :  { %s39_s13 = sshll.u32 %s331_s12, 4  ;;  %p278_p2 = scmp.ne.s32.totalorder %s462_s2, %s277_s17  ;;  %s40_s13 = int_to_ptr.vmem [resolvable:$true] %s39_s13 }
  0x28   :  { %p281_p3 = scmp.lt.u32.totalorder %s277_s17, %s462_s2 }
  0x2a   :  { %p283_p4 = pnand %p281_p3, %p278_p2 }
  0x2c   :  { %286 = shalt.err (!%p283_p4)
}
  0x2d   :  { %s287_s22 = scalar_lea.vmem %s40_s13, 16  ;;  %s291_s0 = scalar_lea.vmem %s40_s13, 32 }
  0x2e   :  { %p288_p5 = scmp.ne.s32.totalorder %s40_s13, %s287_s22  ;;  %p292_p6 = scmp.lt.s32.totalorder %s40_s13, %s40_s13 }
  0x2f   :  { %p293_p7 = scmp.lt.s32.totalorder %s291_s0, %s287_s22 }
  0x31   :  { %p294_p8 = por %p293_p7, %p292_p6 }
  0x33   :  { %p295_p9 = pnand %p294_p8, %p288_p5 }
  0x35   :  { %298 = shalt.err (!%p295_p9)
}
  0x36   :  { %42 = dma.hbm_to_vmem [thread:$0]  %s462_s2, 16, %s40_s13, [#allocation6]  }
  0x37   :  { %321 = dma.done.wait [#allocation3], 128  }
  0x38   :  { %322 = vsyncadd [#allocation3], 4294967168 }
  0x39   :  { %323 = dma.done.wait [#allocation6], 32  }
  0x3a   :  { %324 = vsyncadd [#allocation6], 4294967264  ;;  %v402_v0 = vld [vmem:[#allocation2] sm:$0xff]  ;;  %s332_s24 = smov 96   ;;  %s333_s25 = smov 32   ;;  %vm55_vm0 = vcmask 261120  }
  0x3b   :  { %81 = vrot.lane.b32.xlu0 %v402_v0, %s332_s24  ;;  %140 = vrot.lane.b32.xlu1 %v402_v0, %s333_s25  ;;  %v59_v1 = vmul.f32 %v402_v0, %v402_v0  ;;  %v56_v2 = vsel %vm55_vm0, %v402_v0, 0.0  ;;  %vm170_vm9 = vcmask 523264   ;;  %vm172_vm10 = vcmask 785408  }
  0x3d   :  { %v60_v3 = vsel %vm55_vm0, %v59_v1, 0.0 }
  0x3f   :  { %111 = vrot.lane.b32.xlu0 %v402_v0, %s329_s8  ;;  %88 = vrot.lane.b32.xlu1 %v59_v1, %s332_s24 }
  0x43   :  { %117 = vrot.lane.b32.xlu0 %v59_v1, %s329_s8  ;;  %146 = vrot.lane.b32.xlu1 %v59_v1, %s333_s25 }
  0x62   :  { %57 = vadd.xlane.f32.xlu0 %v56_v2 }
  0x67   :  { %61 = vadd.xlane.f32.xlu1 %v60_v3 }
  0xad   :  { %v82_v4 = vpop.permute.xlu0 %81  ;;  %v141_v5 = vpop.permute.xlu1 %140 }
  0xae   :  { %v84_v6 = vsel %vm55_vm0, %v82_v4, 0.0  ;;  %v143_v13 = vsel %vm55_vm0, %v141_v5, 0.0 }
  0xaf   :  { %85 = vadd.xlane.f32.xlu0 %v84_v6 }
  0xb1   :  { %v112_v7 = vpop.permute.xlu0 %111  ;;  %v89_v8 = vpop.permute.xlu1 %88 }
  0xb2   :  { %v114_v9 = vsel %vm55_vm0, %v112_v7, 0.0  ;;  %v91_v10 = vsel %vm55_vm0, %v89_v8, 0.0 }
  0xb3   :  { %115 = vadd.xlane.f32.xlu1 %v114_v9  ;;  %92 = vadd.xlane.f32.xlu0 %v91_v10 }
  0xb5   :  { %v118_v11 = vpop.permute.xlu0 %117  ;;  %v147_v12 = vpop.permute.xlu1 %146 }
  0xb6   :  { %v120_v14 = vsel %vm55_vm0, %v118_v11, 0.0  ;;  %v149_v15 = vsel %vm55_vm0, %v147_v12, 0.0 }
  0xb7   :  { %144 = vadd.xlane.f32.xlu1 %v143_v13  ;;  %121 = vadd.xlane.f32.xlu0 %v120_v14 }
  0xbb   :  { %150 = vadd.xlane.f32.xlu0 %v149_v15 }
  0xef   :  { %v58_v16 = vpop.xlane.xlu0 %57 }
  0xf0   :  { %v420_v17 = vmul.f32 0.03125, %v58_v16 }
  0xf2   :  { %v64_v18 = vmul.f32 %v420_v17, %v420_v17  ;;  %v78_v11 = vsub.f32 %v402_v0, %v420_v17 }
  0xf4   :  { %v65_v19 = vmul.f32 32.0, %v64_v18  ;;  %v62_v20 = vpop.xlane.xlu1 %61 }
  0xf6   :  { %v66_v21 = vsub.f32 %v62_v20, %v65_v19 }
  0xf8   :  { %v67_v23 = vmul.f32 0.032258064, %v66_v21  ;;  %v207_v21 = vld [vmem:[#allocation5] ss:$0 sm:$0xff] }
  0xfa   :  { %v68_v28 = vmax.f32 %v67_v23, 0.0 }
  0xfc   :  { %217 = vrsqrt.f32 %v68_v28  ;;  %vm71_vm1 = vcmp.eq.f32.partialorder %v68_v28, inf  ;;  %v74_v52 = vand.u32 2147483648, %v68_v28  ;;  %vm73_vm3 = vcmp.eq.f32.partialorder %v68_v28, 0.0 }
 0x106   :  { %v218_v46 = vpop.eup %217 }
 0x107   :  { %v70_v49 = vmul.f32 %v218_v46, %v68_v28 }
 0x109   :  { %v72_v54 = vsel %vm71_vm1, %v68_v28, %v70_v49 }
 0x10a   :  { %v75_v58 = vsel %vm73_vm3, %v74_v52, %v72_v54 }
 0x10b   :  { %v76_v63 = vadd.f32 0.0001, %v75_v58 }
 0x13c   :  { %v86_v22 = vpop.xlane.xlu0 %85 }
 0x13d   :  { %v424_v24 = vmul.f32 0.03125, %v86_v22 }
 0x13f   :  { %v95_v25 = vmul.f32 %v424_v24, %v424_v24  ;;  %v109_v12 = vsub.f32 %v402_v0, %v424_v24 }
 0x140   :  { %v116_v26 = vpop.xlane.xlu1 %115  ;;  %v93_v27 = vpop.xlane.xlu0 %92 }
 0x141   :  { %v428_v29 = vmul.f32 0.03125, %v116_v26  ;;  %v96_v30 = vmul.f32 32.0, %v95_v25  ;;  %v208_v25 = vld [vmem:[#allocation7] ss:$0 sm:$0xff] }
 0x143   :  { %v124_v31 = vmul.f32 %v428_v29, %v428_v29  ;;  %v97_v32 = vsub.f32 %v93_v27, %v96_v30  ;;  %v138_v14 = vsub.f32 %v402_v0, %v428_v29 }
 0x144   :  { %v145_v33 = vpop.xlane.xlu1 %144  ;;  %v122_v34 = vpop.xlane.xlu0 %121 }
 0x145   :  { %v98_v35 = vmul.f32 0.032258064, %v97_v32  ;;  %v432_v36 = vmul.f32 0.03125, %v145_v33  ;;  %v125_v37 = vmul.f32 32.0, %v124_v31 }
 0x147   :  { %v99_v38 = vmax.f32 %v98_v35, 0.0  ;;  %v153_v39 = vmul.f32 %v432_v36, %v432_v36  ;;  %v126_v40 = vsub.f32 %v122_v34, %v125_v37  ;;  %v167_v19 = vsub.f32 %v402_v0, %v432_v36 }
 0x148   :  { %v151_v41 = vpop.xlane.xlu0 %150 }
 0x149   :  { %219 = vrsqrt.f32 %v99_v38  ;;  %v154_v42 = vmul.f32 32.0, %v153_v39  ;;  %v127_v43 = vmul.f32 0.032258064, %v126_v40  ;;  %vm102_vm2 = vcmp.eq.f32.partialorder %v99_v38, inf }
 0x14a   :  { %v105_v53 = vand.u32 2147483648, %v99_v38  ;;  %vm104_vm4 = vcmp.eq.f32.partialorder %v99_v38, 0.0 }
 0x14b   :  { %v128_v44 = vmax.f32 %v127_v43, 0.0  ;;  %v155_v45 = vsub.f32 %v151_v41, %v154_v42 }
 0x14d   :  { %221 = vrsqrt.f32 %v128_v44  ;;  %v156_v47 = vmul.f32 0.032258064, %v155_v45  ;;  %vm131_vm5 = vcmp.eq.f32.partialorder %v128_v44, inf  ;;  %v134_v61 = vand.u32 2147483648, %v128_v44 }
 0x14e   :  { %vm133_vm6 = vcmp.eq.f32.partialorder %v128_v44, 0.0 }
 0x14f   :  { %v157_v48 = vmax.f32 %v156_v47, 0.0 }
 0x151   :  { %223 = vrsqrt.f32 %v157_v48  ;;  %vm160_vm7 = vcmp.eq.f32.partialorder %v157_v48, inf  ;;  %v163_v5 = vand.u32 2147483648, %v157_v48  ;;  %vm162_vm8 = vcmp.eq.f32.partialorder %v157_v48, 0.0 }
 0x153   :  { %v220_v50 = vpop.eup %219 }
 0x154   :  { %v101_v51 = vmul.f32 %v220_v50, %v99_v38 }
 0x156   :  { %v103_v55 = vsel %vm102_vm2, %v99_v38, %v101_v51 }
 0x157   :  { %v106_v56 = vsel %vm104_vm4, %v105_v53, %v103_v55  ;;  %v222_v57 = vpop.eup %221 }
 0x158   :  { %v130_v59 = vmul.f32 %v222_v57, %v128_v44  ;;  %v107_v60 = vadd.f32 0.0001, %v106_v56 }
 0x15a   :  { %v132_v62 = vsel %vm131_vm5, %v128_v44, %v130_v59  ;;  %225 = vrcp.f32 %v107_v60 }
 0x15b   :  { %v135_v1 = vsel %vm133_vm6, %v134_v61, %v132_v62  ;;  %v224_v2 = vpop.eup %223 }
 0x15c   :  { %v136_v3 = vadd.f32 0.0001, %v135_v1  ;;  %v159_v4 = vmul.f32 %v224_v2, %v157_v48 }
 0x15e   :  { %227 = vrcp.f32 %v136_v3  ;;  %v161_v6 = vsel %vm160_vm7, %v157_v48, %v159_v4 }
 0x15f   :  { %229 = vrcp.f32 %v76_v63  ;;  %v164_v7 = vsel %vm162_vm8, %v163_v5, %v161_v6 }
 0x160   :  { %v165_v8 = vadd.f32 0.0001, %v164_v7 }
 0x162   :  { %231 = vrcp.f32 %v165_v8 }
 0x164   :  { %v226_v9 = vpop.eup %225 }
 0x165   :  { %v110_v15 = vmul.f32 %v226_v9, %v109_v12 }
 0x168   :  { %v228_v10 = vpop.eup %227 }
 0x169   :  { %v230_v13 = vpop.eup %229  ;;  %v139_v16 = vmul.f32 %v228_v10, %v138_v14 }
 0x16a   :  { %v79_v18 = vmul.f32 %v230_v13, %v78_v11 }
 0x16c   :  { %v232_v20 = vpop.eup %231  ;;  %v169_v22 = vsel %vm55_vm0, %v79_v18, %v110_v15 }
 0x16d   :  { %v168_v17 = vmul.f32 %v232_v20, %v167_v19  ;;  %v171_v23 = vsel %vm170_vm9, %v169_v22, %v139_v16 }
 0x16f   :  { %v173_v24 = vsel %vm172_vm10, %v171_v23, %v168_v17 }
 0x170   :  { %v180_v26 = vmul.f32 %v207_v21, %v173_v24 }
 0x172   :  { %v187_v27 = vadd.f32 %v208_v25, %v180_v26 }
 0x174   :  { %188 = vst [vmem:[#allocation8] sm:$0xff] %v187_v27 }
 0x175   :  { %193 = vsyncadd [#allocation4], 64  ;;  %s334_s2 = smov [#allocation8]  }
 0x176   :  { %s194_s26 = sshll.u32 %s334_s2, 4  ;;  %s195_s26 = int_to_ptr.vmem [resolvable:$true] %s194_s26 }
 0x177   :  { %s299_s27 = scalar_lea.vmem %s195_s26, 64  ;;  %s303_s28 = scalar_lea.vmem %s195_s26, 128 }
 0x178   :  { %p300_p10 = scmp.ne.s32.totalorder %s195_s26, %s299_s27  ;;  %p304_p11 = scmp.lt.s32.totalorder %s195_s26, %s195_s26 }
 0x179   :  { %p305_p12 = scmp.lt.s32.totalorder %s303_s28, %s299_s27 }
 0x17b   :  { %p306_p13 = por %p305_p12, %p304_p11 }
 0x17d   :  { %p307_p0 = pnand %p306_p13, %p300_p10 }
 0x17f   :  { %310 = shalt.err (!%p307_p0)
}
 0x180   :  { %s311_s4 = scalar_lea.hbm %s463_s3, 64 }
 0x181   :  { %p312_p1 = scmp.ne.s32.totalorder %s463_s3, %s311_s4  ;;  %p315_p2 = scmp.lt.u32.totalorder %s311_s4, %s463_s3 }
 0x183   :  { %p317_p3 = pnand %p315_p2, %p312_p1 }
 0x185   :  { %320 = shalt.err (!%p317_p3)
}
 0x186   :  { %200 = dma.vmem_to_hbm [thread:$0]  %s195_s26, 64, %s463_s3, [#allocation4], %s329_s8, %s329_s8, %s330_s9  }
 0x187   :  { %325 = dma.done.wait [#allocation4], 128  }
 0x188   :  { %326 = vsyncadd [#allocation4], 4294967168 }
 0x189   :  { %204 = vsyncpa [#allocation3], 1 }
 0x18a   :  { %205 = vsyncpa [#allocation6], 1 }
 0x18b   :  { %206 = vsyncpa [#allocation4], 1 }

</bundles_post_ra>
